<compile_context>
chip_gen: v7x
topology: tpu7x:2x2x1
jax: 0.10.0
libtpu: 0.0.40
codegen_flags: <defaults>
</compile_context>

<pallas_src>
import functools

import jax
import jax.numpy as jnp
from jax import lax
from jax.experimental import pallas as pl
from jax.experimental.pallas import tpu as pltpu


def _mmd_kernel(src_ref, tar_ref, out_ref,
                ss_acc, tt_acc, st_acc,
                *, batch, kernel_mul, kernel_num, fix_sigma, precision):
    k = pl.program_id(0)
    nk = pl.num_programs(0)

    @pl.when(k == 0)
    def _init():
        ss_acc[...] = jnp.zeros_like(ss_acc)
        tt_acc[...] = jnp.zeros_like(tt_acc)
        st_acc[...] = jnp.zeros_like(st_acc)

    # Per-chunk work is exactly three gram-quadrant matmuls (no norm path).
    s = src_ref[...]                      # (B, TK), native dtype -> MXU
    t = tar_ref[...]
    dn = (((1,), (1,)), ((), ()))         # contract the feature axis of both

    ss_acc[...] += lax.dot_general(s, s, dn, preferred_element_type=jnp.float32,
                                   precision=precision)
    tt_acc[...] += lax.dot_general(t, t, dn, preferred_element_type=jnp.float32,
                                   precision=precision)
    st_acc[...] += lax.dot_general(s, t, dn, preferred_element_type=jnp.float32,
                                   precision=precision)

    @pl.when(k == nk - 1)
    def _epilogue():
        ss = ss_acc[...]
        tt = tt_acc[...]
        st = st_acc[...]

        # Row squared norms = diag of the self-grams. Extract once here and
        # read the masked matrix out along both axes to get the column (B,1)
        # and row (1,B) orientations without any transpose. l2_ss/l2_tt
        # diagonals then cancel to exactly 0, matching the reference.
        ri = lax.broadcasted_iota(jnp.int32, (batch, batch), 0)
        ci = lax.broadcasted_iota(jnp.int32, (batch, batch), 1)
        eye = ri == ci
        ss_d = jnp.where(eye, ss, 0.0)
        tt_d = jnp.where(eye, tt, 0.0)
        sqs_c = jnp.sum(ss_d, axis=1, keepdims=True)   # (B,1): ||s_i||^2
        sqs_r = jnp.sum(ss_d, axis=0, keepdims=True)   # (1,B): ||s_j||^2
        sqt_c = jnp.sum(tt_d, axis=1, keepdims=True)
        sqt_r = jnp.sum(tt_d, axis=0, keepdims=True)

        # Pairwise squared L2 per quadrant; clamp tiny negative cancellation.
        l2_ss = jnp.maximum(sqs_c + sqs_r - 2.0 * ss, 0.0)
        l2_tt = jnp.maximum(sqt_c + sqt_r - 2.0 * tt, 0.0)
        l2_st = jnp.maximum(sqs_c + sqt_r - 2.0 * st, 0.0)

        n = 2 * batch
        if fix_sigma is not None:
            bandwidth = jnp.full((1, 1), fix_sigma, jnp.float32)
        else:
            # sum over full (2B,2B) L2 = sum(SS) + sum(TT) + 2*sum(ST)
            sum_l2 = (jnp.sum(l2_ss, keepdims=True)
                      + jnp.sum(l2_tt, keepdims=True)
                      + 2.0 * jnp.sum(l2_st, keepdims=True))
            bandwidth = sum_l2 / float(n * n - n)
        bandwidth = bandwidth / (kernel_mul ** (kernel_num // 2))

        # Hoisted reciprocal: one (1,1) divide total; each exp needs only a
        # single multiply for the exponent (loop is purely EUP-bound).
        neg_inv_bw = -1.0 / bandwidth

        # Sign folded into quadrants: mean(XX + YY - XY - YX)
        #   = [sum(K_SS) + sum(K_TT) - 2*sum(K_ST)] / B^2.
        # Scalar partial sums per bandwidth (no persistent (B,B) kern_sum).
        acc = jnp.zeros((1, 1), jnp.float32)
        for i in range(kernel_num):
            scale = neg_inv_bw * float(1.0 / (kernel_mul ** i))   # (1,1)
            acc = acc + (jnp.sum(jnp.exp(l2_ss * scale), keepdims=True)
                         + jnp.sum(jnp.exp(l2_tt * scale), keepdims=True)
                         - 2.0 * jnp.sum(jnp.exp(l2_st * scale), keepdims=True))

        out_ref[...] = (acc / float(batch * batch)).astype(out_ref.dtype)


def mmd_loss_pallas(src, tar, kernel_mul=2.0, kernel_num=5, fix_sigma=None,
                    precision=None, block_k=None):
    B, D = src.shape
    assert tar.shape == (B, D)

    LANE = 128
    itemsize = jnp.dtype(src.dtype).itemsize

    # Generation-aware VMEM budget (v5e/v6e: 128 MiB, v7x: 64 MiB per TC).
    try:
        vmem_cap = int(pltpu.get_tpu_info().vmem_capacity_bytes)
    except Exception:
        vmem_cap = 64 << 20                      # conservative (v7x per-TC)
    vmem_ceiling = (vmem_cap * 3) // 4           # leave compiler headroom

    # Fixed-resident VMEM: 3 (B,B) f32 gram accumulators + epilogue
    # temporaries (l2 matrices, masks, exp temporaries) ~ 8*B^2 f32.
    bb = B * B * 4
    fixed_bytes = 3 * bb + 8 * bb

    if block_k is None:
        # Budget the double-buffered input tiles (2 inputs x 2 buffers x B x tk)
        # to ~half of the scoped VMEM; cap at 4096 lanes (already ~HBM roofline).
        input_budget = max(vmem_ceiling // 2 - fixed_bytes,
                           4 * B * LANE * itemsize)
        tk_budget = max(LANE, (input_budget // (4 * B * itemsize)) // LANE * LANE)
        tk_cap = int(min(tk_budget, 4096))
    else:
        tk_cap = int(block_k)

    if D <= tk_cap:
        tk = D                                   # full-dim block (== array dim)
        d_pad = D
    else:
        tk = tk_cap
        d_pad = ((D + tk - 1) // tk) * tk
        # Zero-padding features changes neither the grams nor the norms.
        src = jnp.pad(src, ((0, 0), (0, d_pad - D)))
        tar = jnp.pad(tar, ((0, 0), (0, d_pad - D)))
    nk = d_pad // tk

    est_bytes = 4 * B * tk * itemsize + fixed_bytes
    vmem_limit = int(min(max(2 * est_bytes, 16 << 20), vmem_ceiling))

    kernel = functools.partial(
        _mmd_kernel, batch=B, kernel_mul=float(kernel_mul),
        kernel_num=int(kernel_num), fix_sigma=fix_sigma, precision=precision)

    out = pl.pallas_call(
        kernel,
        out_shape=jax.ShapeDtypeStruct((1, 1), jnp.float32),
        grid_spec=pltpu.PrefetchScalarGridSpec(
            num_scalar_prefetch=0,
            grid=(nk,),
            in_specs=[pl.BlockSpec((B, tk), lambda k: (0, k)),
                      pl.BlockSpec((B, tk), lambda k: (0, k))],
            out_specs=pl.BlockSpec((1, 1), lambda k: (0, 0)),
            scratch_shapes=[
                pltpu.VMEM((B, B), jnp.float32),   # S·Sᵀ
                pltpu.VMEM((B, B), jnp.float32),   # T·Tᵀ
                pltpu.VMEM((B, B), jnp.float32),   # S·Tᵀ
            ]),
        compiler_params=pltpu.CompilerParams(
            dimension_semantics=("arbitrary",),
            vmem_limit_bytes=vmem_limit),
    )(src, tar)
    return out[0, 0]


def mmd_loss_ref(src, tar, kernel_mul=2.0, kernel_num=5, fix_sigma=None):
    # Pure-JAX reference mirroring the PyTorch formulation (broadcasted diff).
    B = src.shape[0]
    total = jnp.concatenate([src, tar], axis=0).astype(jnp.float32)
    n = total.shape[0]
    diff = total[None, :, :] - total[:, None, :]
    l2 = jnp.sum(diff ** 2, axis=2)
    if fix_sigma is not None:
        bw = jnp.float32(fix_sigma)
    else:
        bw = jnp.sum(l2) / (n * n - n)
    bw = bw / (kernel_mul ** (kernel_num // 2))
    kern = sum(jnp.exp(-l2 / (bw * kernel_mul ** i)) for i in range(kernel_num))
    XX = kern[:B, :B]
    YY = kern[B:, B:]
    XY = kern[:B, B:]
    YX = kern[B:, :B]
    return jnp.mean(XX + YY - XY - YX)


if __name__ == "__main__":
    key = jax.random.PRNGKey(0)
    k1, k2, k3, k4 = jax.random.split(key, 4)

    # Small shape consistent with the module (flat feature vectors).
    B, D = 8, 32
    src = jax.random.normal(k1, (B, D), dtype=jnp.float32)
    tar = jax.random.normal(k2, (B, D), dtype=jnp.float32) + 0.5

    loss = jax.block_until_ready(mmd_loss_pallas(src, tar))
    ref = jax.block_until_ready(mmd_loss_ref(src, tar))
    assert jnp.allclose(loss, ref, rtol=1e-4, atol=1e-5), (loss, ref)

    # Exercise the K-tiled (multi-chunk, pipelined) accumulation path as well
    # (block_k override keeps the test shape small while forcing nk > 1).
    B2, D2 = 8, 1024
    src2 = jax.random.normal(k3, (B2, D2), dtype=jnp.float32)
    tar2 = jax.random.normal(k4, (B2, D2), dtype=jnp.float32) + 0.25
    loss2 = jax.block_until_ready(mmd_loss_pallas(src2, tar2, block_k=256))
    ref2 = jax.block_until_ready(mmd_loss_ref(src2, tar2))
    assert jnp.allclose(loss2, ref2, rtol=1e-4, atol=1e-5), (loss2, ref2)

    # Default (auto-sized tile) path on the same data.
    loss3 = jax.block_until_ready(mmd_loss_pallas(src2, tar2))
    assert jnp.allclose(loss3, ref2, rtol=1e-4, atol=1e-5), (loss3, ref2)

    print("KERNEL_OK")
</pallas_src>

<mosaic_0001>
module attributes {stable_mosaic.version = 11 : i64} {
  func.func @_mmd_kernel(%arg0: i32, %arg1: memref<8x32xf32, #tpu.memory_space<vmem>>, %arg2: memref<8x32xf32, #tpu.memory_space<vmem>>, %arg3: memref<1x1xf32, #tpu.memory_space<vmem>>, %arg4: memref<8x8xf32, #tpu.memory_space<vmem>>, %arg5: memref<8x8xf32, #tpu.memory_space<vmem>>, %arg6: memref<8x8xf32, #tpu.memory_space<vmem>>) attributes {dimension_semantics = [#tpu.dimension_semantics<arbitrary>], iteration_bounds = array<i64: 1>, scalar_prefetch = 0 : i64, scratch_operands = 3 : i64, tpu.core_type = #tpu.core_type<tc>, window_params = [{transform_indices = @transform_0, window_bounds = array<i64: 8, 32>}, {transform_indices = @transform_1, window_bounds = array<i64: 8, 32>}, {pipeline_mode = #tpu.pipeline_mode<synchronous>, transform_indices = @transform_2, window_bounds = array<i64: 1, 1>}]} {
    %c0_i32 = arith.constant 0 : i32
    %0 = arith.cmpi eq, %arg0, %c0_i32 : i32
    %1 = arith.extui %0 : i1 to i32
    %c0_i32_0 = arith.constant 0 : i32
    %2 = arith.cmpi ne, %1, %c0_i32_0 : i32
    scf.if %2 {
      %cst_20 = arith.constant 0.000000e+00 : f32
      %20 = vector.broadcast %cst_20 : f32 to vector<8x8xf32>
      %c0_21 = arith.constant 0 : index
      %c0_22 = arith.constant 0 : index
      %21 = vector.load %arg4[%c0_21, %c0_22] : memref<8x8xf32, #tpu.memory_space<vmem>>, vector<8x8xf32>
      tpu.vector_store %arg4[%c0_21, %c0_22], %20 {strides = array<i32>} : memref<8x8xf32, #tpu.memory_space<vmem>>, vector<8x8xf32>,
      %cst_23 = arith.constant 0.000000e+00 : f32
      %22 = vector.broadcast %cst_23 : f32 to vector<8x8xf32>
      %c0_24 = arith.constant 0 : index
      %c0_25 = arith.constant 0 : index
      %23 = vector.load %arg5[%c0_24, %c0_25] : memref<8x8xf32, #tpu.memory_space<vmem>>, vector<8x8xf32>
      tpu.vector_store %arg5[%c0_24, %c0_25], %22 {strides = array<i32>} : memref<8x8xf32, #tpu.memory_space<vmem>>, vector<8x8xf32>,
      %cst_26 = arith.constant 0.000000e+00 : f32
      %24 = vector.broadcast %cst_26 : f32 to vector<8x8xf32>
      %c0_27 = arith.constant 0 : index
      %c0_28 = arith.constant 0 : index
      %25 = vector.load %arg6[%c0_27, %c0_28] : memref<8x8xf32, #tpu.memory_space<vmem>>, vector<8x8xf32>
      tpu.vector_store %arg6[%c0_27, %c0_28], %24 {strides = array<i32>} : memref<8x8xf32, #tpu.memory_space<vmem>>, vector<8x8xf32>,
    } else {
    }
    %c0 = arith.constant 0 : index
    %c0_1 = arith.constant 0 : index
    %3 = vector.load %arg1[%c0, %c0_1] : memref<8x32xf32, #tpu.memory_space<vmem>>, vector<8x32xf32>
    %c0_2 = arith.constant 0 : index
    %c0_3 = arith.constant 0 : index
    %4 = vector.load %arg2[%c0_2, %c0_3] : memref<8x32xf32, #tpu.memory_space<vmem>>, vector<8x32xf32>
    %c0_4 = arith.constant 0 : index
    %c0_5 = arith.constant 0 : index
    %5 = vector.load %arg4[%c0_4, %c0_5] : memref<8x8xf32, #tpu.memory_space<vmem>>, vector<8x8xf32>
    %cst = arith.constant dense<0.000000e+00> : vector<8x8xf32>
    %6 = tpu.matmul %3, %3, %cst {dimension_numbers = #tpu.dot_dimension_numbers<[1], [1], [0], [0], [0, 0, 1, 0], [], []>} : vector<8x32xf32>, vector<8x32xf32>, vector<8x8xf32> -> vector<8x8xf32>
    %7 = arith.addf %5, %6 : vector<8x8xf32>
    %c0_6 = arith.constant 0 : index
    %c0_7 = arith.constant 0 : index
    %8 = vector.load %arg4[%c0_6, %c0_7] : memref<8x8xf32, #tpu.memory_space<vmem>>, vector<8x8xf32>
    tpu.vector_store %arg4[%c0_6, %c0_7], %7 {strides = array<i32>} : memref<8x8xf32, #tpu.memory_space<vmem>>, vector<8x8xf32>,
    %c0_8 = arith.constant 0 : index
    %c0_9 = arith.constant 0 : index
    %9 = vector.load %arg5[%c0_8, %c0_9] : memref<8x8xf32, #tpu.memory_space<vmem>>, vector<8x8xf32>
    %cst_10 = arith.constant dense<0.000000e+00> : vector<8x8xf32>
    %10 = tpu.matmul %4, %4, %cst_10 {dimension_numbers = #tpu.dot_dimension_numbers<[1], [1], [0], [0], [0, 0, 1, 0], [], []>} : vector<8x32xf32>, vector<8x32xf32>, vector<8x8xf32> -> vector<8x8xf32>
    %11 = arith.addf %9, %10 : vector<8x8xf32>
    %c0_11 = arith.constant 0 : index
    %c0_12 = arith.constant 0 : index
    %12 = vector.load %arg5[%c0_11, %c0_12] : memref<8x8xf32, #tpu.memory_space<vmem>>, vector<8x8xf32>
    tpu.vector_store %arg5[%c0_11, %c0_12], %11 {strides = array<i32>} : memref<8x8xf32, #tpu.memory_space<vmem>>, vector<8x8xf32>,
    %c0_13 = arith.constant 0 : index
    %c0_14 = arith.constant 0 : index
    %13 = vector.load %arg6[%c0_13, %c0_14] : memref<8x8xf32, #tpu.memory_space<vmem>>, vector<8x8xf32>
    %cst_15 = arith.constant dense<0.000000e+00> : vector<8x8xf32>
    %14 = tpu.matmul %3, %4, %cst_15 {dimension_numbers = #tpu.dot_dimension_numbers<[1], [1], [0], [0], [0, 0, 1, 0], [], []>} : vector<8x32xf32>, vector<8x32xf32>, vector<8x8xf32> -> vector<8x8xf32>
    %15 = arith.addf %13, %14 : vector<8x8xf32>
    %c0_16 = arith.constant 0 : index
    %c0_17 = arith.constant 0 : index
    %16 = vector.load %arg6[%c0_16, %c0_17] : memref<8x8xf32, #tpu.memory_space<vmem>>, vector<8x8xf32>
    tpu.vector_store %arg6[%c0_16, %c0_17], %15 {strides = array<i32>} : memref<8x8xf32, #tpu.memory_space<vmem>>, vector<8x8xf32>,
    %c0_i32_18 = arith.constant 0 : i32
    %17 = arith.cmpi eq, %arg0, %c0_i32_18 : i32
    %18 = arith.extui %17 : i1 to i32
    %c0_i32_19 = arith.constant 0 : i32
    %19 = arith.cmpi ne, %18, %c0_i32_19 : i32
    scf.if %19 {
      %c0_20 = arith.constant 0 : index
      %c0_21 = arith.constant 0 : index
      %20 = vector.load %arg4[%c0_20, %c0_21] : memref<8x8xf32, #tpu.memory_space<vmem>>, vector<8x8xf32>
      %c0_22 = arith.constant 0 : index
      %c0_23 = arith.constant 0 : index
      %21 = vector.load %arg5[%c0_22, %c0_23] : memref<8x8xf32, #tpu.memory_space<vmem>>, vector<8x8xf32>
      %c0_24 = arith.constant 0 : index
      %c0_25 = arith.constant 0 : index
      %22 = vector.load %arg6[%c0_24, %c0_25] : memref<8x8xf32, #tpu.memory_space<vmem>>, vector<8x8xf32>
      %23 = tpu.iota {dimensions = array<i32: 0>} : vector<8x8xi32>
      %24 = tpu.iota {dimensions = array<i32: 1>} : vector<8x8xi32>
      %25 = arith.cmpi eq, %23, %24 : vector<8x8xi32>
      %cst_26 = arith.constant 0.000000e+00 : f32
      %26 = vector.broadcast %cst_26 : f32 to vector<8x8xf32>
      %27 = arith.select %25, %20, %26 : vector<8x8xi1>, vector<8x8xf32>
      %cst_27 = arith.constant 0.000000e+00 : f32
      %28 = vector.broadcast %cst_27 : f32 to vector<8x8xf32>
      %29 = arith.select %25, %21, %28 : vector<8x8xi1>, vector<8x8xf32>
      %cst_28 = arith.constant dense<0.000000e+00> : vector<8xf32>
      %30 = vector.multi_reduction <add>, %27, %cst_28 [1] : vector<8x8xf32> to vector<8xf32>
      %31 = vector.shape_cast %30 : vector<8xf32> to vector<8x1xf32>
      %cst_29 = arith.constant dense<0.000000e+00> : vector<8xf32>
      %32 = vector.multi_reduction <add>, %27, %cst_29 [0] : vector<8x8xf32> to vector<8xf32>
      %33 = vector.shape_cast %32 : vector<8xf32> to vector<1x8xf32>
      %cst_30 = arith.constant dense<0.000000e+00> : vector<8xf32>
      %34 = vector.multi_reduction <add>, %29, %cst_30 [1] : vector<8x8xf32> to vector<8xf32>
      %35 = vector.shape_cast %34 : vector<8xf32> to vector<8x1xf32>
      %cst_31 = arith.constant dense<0.000000e+00> : vector<8xf32>
      %36 = vector.multi_reduction <add>, %29, %cst_31 [0] : vector<8x8xf32> to vector<8xf32>
      %37 = vector.shape_cast %36 : vector<8xf32> to vector<1x8xf32>
      %38 = vector.broadcast %31 : vector<8x1xf32> to vector<8x8xf32>
      %39 = vector.broadcast %33 : vector<1x8xf32> to vector<8x8xf32>
      %40 = arith.addf %38, %39 : vector<8x8xf32>
      %cst_32 = arith.constant 2.000000e+00 : f32
      %41 = vector.broadcast %cst_32 : f32 to vector<8x8xf32>
      %42 = arith.mulf %41, %20 : vector<8x8xf32>
      %43 = arith.subf %40, %42 : vector<8x8xf32>
      %cst_33 = arith.constant 0.000000e+00 : f32
      %44 = vector.broadcast %cst_33 : f32 to vector<8x8xf32>
      %45 = arith.maximumf %43, %44 : vector<8x8xf32>
      %46 = vector.broadcast %35 : vector<8x1xf32> to vector<8x8xf32>
      %47 = vector.broadcast %37 : vector<1x8xf32> to vector<8x8xf32>
      %48 = arith.addf %46, %47 : vector<8x8xf32>
      %cst_34 = arith.constant 2.000000e+00 : f32
      %49 = vector.broadcast %cst_34 : f32 to vector<8x8xf32>
      %50 = arith.mulf %49, %21 : vector<8x8xf32>
      %51 = arith.subf %48, %50 : vector<8x8xf32>
      %cst_35 = arith.constant 0.000000e+00 : f32
      %52 = vector.broadcast %cst_35 : f32 to vector<8x8xf32>
      %53 = arith.maximumf %51, %52 : vector<8x8xf32>
      %54 = vector.broadcast %31 : vector<8x1xf32> to vector<8x8xf32>
      %55 = vector.broadcast %37 : vector<1x8xf32> to vector<8x8xf32>
      %56 = arith.addf %54, %55 : vector<8x8xf32>
      %cst_36 = arith.constant 2.000000e+00 : f32
      %57 = vector.broadcast %cst_36 : f32 to vector<8x8xf32>
      %58 = arith.mulf %57, %22 : vector<8x8xf32>
      %59 = arith.subf %56, %58 : vector<8x8xf32>
      %cst_37 = arith.constant 0.000000e+00 : f32
      %60 = vector.broadcast %cst_37 : f32 to vector<8x8xf32>
      %61 = arith.maximumf %59, %60 : vector<8x8xf32>
      %62 = vector.shape_cast %45 : vector<8x8xf32> to vector<1x8x8xf32>
      %cst_38 = arith.constant dense<0.000000e+00> : vector<1xf32>
      %63 = vector.multi_reduction <add>, %62, %cst_38 [1, 2] : vector<1x8x8xf32> to vector<1xf32>
      %64 = vector.shape_cast %63 : vector<1xf32> to vector<1x1x1xf32>
      %65 = vector.extract %64[0, 0, 0] : f32 from vector<1x1x1xf32>
      %66 = vector.broadcast %65 : f32 to vector<1x1xf32>
      %67 = vector.shape_cast %53 : vector<8x8xf32> to vector<1x8x8xf32>
      %cst_39 = arith.constant dense<0.000000e+00> : vector<1xf32>
      %68 = vector.multi_reduction <add>, %67, %cst_39 [1, 2] : vector<1x8x8xf32> to vector<1xf32>
      %69 = vector.shape_cast %68 : vector<1xf32> to vector<1x1x1xf32>
      %70 = vector.extract %69[0, 0, 0] : f32 from vector<1x1x1xf32>
      %71 = vector.broadcast %70 : f32 to vector<1x1xf32>
      %72 = arith.addf %66, %71 : vector<1x1xf32>
      %73 = vector.shape_cast %61 : vector<8x8xf32> to vector<1x8x8xf32>
      %cst_40 = arith.constant dense<0.000000e+00> : vector<1xf32>
      %74 = vector.multi_reduction <add>, %73, %cst_40 [1, 2] : vector<1x8x8xf32> to vector<1xf32>
      %75 = vector.shape_cast %74 : vector<1xf32> to vector<1x1x1xf32>
      %76 = vector.extract %75[0, 0, 0] : f32 from vector<1x1x1xf32>
      %77 = vector.broadcast %76 : f32 to vector<1x1xf32>
      %cst_41 = arith.constant 2.000000e+00 : f32
      %78 = vector.broadcast %cst_41 : f32 to vector<1x1xf32>
      %79 = arith.mulf %78, %77 : vector<1x1xf32>
      %80 = arith.addf %72, %79 : vector<1x1xf32>
      %cst_42 = arith.constant 2.400000e+02 : f32
      %81 = vector.broadcast %cst_42 : f32 to vector<1x1xf32>
      %82 = arith.divf %80, %81 : vector<1x1xf32>
      %cst_43 = arith.constant 4.000000e+00 : f32
      %83 = vector.broadcast %cst_43 : f32 to vector<1x1xf32>
      %84 = arith.divf %82, %83 : vector<1x1xf32>
      %cst_44 = arith.constant -1.000000e+00 : f32
      %85 = vector.broadcast %cst_44 : f32 to vector<1x1xf32>
      %86 = arith.divf %85, %84 : vector<1x1xf32>
      %cst_45 = arith.constant 0.000000e+00 : f32
      %87 = vector.broadcast %cst_45 : f32 to vector<1x1xf32>
      %cst_46 = arith.constant 1.000000e+00 : f32
      %88 = vector.broadcast %cst_46 : f32 to vector<1x1xf32>
      %89 = arith.mulf %86, %88 : vector<1x1xf32>
      %90 = vector.broadcast %89 : vector<1x1xf32> to vector<8x8xf32>
      %91 = arith.mulf %45, %90 : vector<8x8xf32>
      %92 = math.exp %91 : vector<8x8xf32>
      %93 = vector.shape_cast %92 : vector<8x8xf32> to vector<1x8x8xf32>
      %cst_47 = arith.constant dense<0.000000e+00> : vector<1xf32>
      %94 = vector.multi_reduction <add>, %93, %cst_47 [1, 2] : vector<1x8x8xf32> to vector<1xf32>
      %95 = vector.shape_cast %94 : vector<1xf32> to vector<1x1x1xf32>
      %96 = vector.extract %95[0, 0, 0] : f32 from vector<1x1x1xf32>
      %97 = vector.broadcast %96 : f32 to vector<1x1xf32>
      %98 = vector.broadcast %89 : vector<1x1xf32> to vector<8x8xf32>
      %99 = arith.mulf %53, %98 : vector<8x8xf32>
      %100 = math.exp %99 : vector<8x8xf32>
      %101 = vector.shape_cast %100 : vector<8x8xf32> to vector<1x8x8xf32>
      %cst_48 = arith.constant dense<0.000000e+00> : vector<1xf32>
      %102 = vector.multi_reduction <add>, %101, %cst_48 [1, 2] : vector<1x8x8xf32> to vector<1xf32>
      %103 = vector.shape_cast %102 : vector<1xf32> to vector<1x1x1xf32>
      %104 = vector.extract %103[0, 0, 0] : f32 from vector<1x1x1xf32>
      %105 = vector.broadcast %104 : f32 to vector<1x1xf32>
      %106 = arith.addf %97, %105 : vector<1x1xf32>
      %107 = vector.broadcast %89 : vector<1x1xf32> to vector<8x8xf32>
      %108 = arith.mulf %61, %107 : vector<8x8xf32>
      %109 = math.exp %108 : vector<8x8xf32>
      %110 = vector.shape_cast %109 : vector<8x8xf32> to vector<1x8x8xf32>
      %cst_49 = arith.constant dense<0.000000e+00> : vector<1xf32>
      %111 = vector.multi_reduction <add>, %110, %cst_49 [1, 2] : vector<1x8x8xf32> to vector<1xf32>
      %112 = vector.shape_cast %111 : vector<1xf32> to vector<1x1x1xf32>
      %113 = vector.extract %112[0, 0, 0] : f32 from vector<1x1x1xf32>
      %114 = vector.broadcast %113 : f32 to vector<1x1xf32>
      %cst_50 = arith.constant 2.000000e+00 : f32
      %115 = vector.broadcast %cst_50 : f32 to vector<1x1xf32>
      %116 = arith.mulf %115, %114 : vector<1x1xf32>
      %117 = arith.subf %106, %116 : vector<1x1xf32>
      %118 = arith.addf %87, %117 : vector<1x1xf32>
      %cst_51 = arith.constant 5.000000e-01 : f32
      %119 = vector.broadcast %cst_51 : f32 to vector<1x1xf32>
      %120 = arith.mulf %86, %119 : vector<1x1xf32>
      %121 = vector.broadcast %120 : vector<1x1xf32> to vector<8x8xf32>
      %122 = arith.mulf %45, %121 : vector<8x8xf32>
      %123 = math.exp %122 : vector<8x8xf32>
      %124 = vector.shape_cast %123 : vector<8x8xf32> to vector<1x8x8xf32>
      %cst_52 = arith.constant dense<0.000000e+00> : vector<1xf32>
      %125 = vector.multi_reduction <add>, %124, %cst_52 [1, 2] : vector<1x8x8xf32> to vector<1xf32>
      %126 = vector.shape_cast %125 : vector<1xf32> to vector<1x1x1xf32>
      %127 = vector.extract %126[0, 0, 0] : f32 from vector<1x1x1xf32>
      %128 = vector.broadcast %127 : f32 to vector<1x1xf32>
      %129 = vector.broadcast %120 : vector<1x1xf32> to vector<8x8xf32>
      %130 = arith.mulf %53, %129 : vector<8x8xf32>
      %131 = math.exp %130 : vector<8x8xf32>
      %132 = vector.shape_cast %131 : vector<8x8xf32> to vector<1x8x8xf32>
      %cst_53 = arith.constant dense<0.000000e+00> : vector<1xf32>
      %133 = vector.multi_reduction <add>, %132, %cst_53 [1, 2] : vector<1x8x8xf32> to vector<1xf32>
      %134 = vector.shape_cast %133 : vector<1xf32> to vector<1x1x1xf32>
      %135 = vector.extract %134[0, 0, 0] : f32 from vector<1x1x1xf32>
      %136 = vector.broadcast %135 : f32 to vector<1x1xf32>
      %137 = arith.addf %128, %136 : vector<1x1xf32>
      %138 = vector.broadcast %120 : vector<1x1xf32> to vector<8x8xf32>
      %139 = arith.mulf %61, %138 : vector<8x8xf32>
      %140 = math.exp %139 : vector<8x8xf32>
      %141 = vector.shape_cast %140 : vector<8x8xf32> to vector<1x8x8xf32>
      %cst_54 = arith.constant dense<0.000000e+00> : vector<1xf32>
      %142 = vector.multi_reduction <add>, %141, %cst_54 [1, 2] : vector<1x8x8xf32> to vector<1xf32>
      %143 = vector.shape_cast %142 : vector<1xf32> to vector<1x1x1xf32>
      %144 = vector.extract %143[0, 0, 0] : f32 from vector<1x1x1xf32>
      %145 = vector.broadcast %144 : f32 to vector<1x1xf32>
      %cst_55 = arith.constant 2.000000e+00 : f32
      %146 = vector.broadcast %cst_55 : f32 to vector<1x1xf32>
      %147 = arith.mulf %146, %145 : vector<1x1xf32>
      %148 = arith.subf %137, %147 : vector<1x1xf32>
      %149 = arith.addf %118, %148 : vector<1x1xf32>
      %cst_56 = arith.constant 2.500000e-01 : f32
      %150 = vector.broadcast %cst_56 : f32 to vector<1x1xf32>
      %151 = arith.mulf %86, %150 : vector<1x1xf32>
      %152 = vector.broadcast %151 : vector<1x1xf32> to vector<8x8xf32>
      %153 = arith.mulf %45, %152 : vector<8x8xf32>
      %154 = math.exp %153 : vector<8x8xf32>
      %155 = vector.shape_cast %154 : vector<8x8xf32> to vector<1x8x8xf32>
      %cst_57 = arith.constant dense<0.000000e+00> : vector<1xf32>
      %156 = vector.multi_reduction <add>, %155, %cst_57 [1, 2] : vector<1x8x8xf32> to vector<1xf32>
      %157 = vector.shape_cast %156 : vector<1xf32> to vector<1x1x1xf32>
      %158 = vector.extract %157[0, 0, 0] : f32 from vector<1x1x1xf32>
      %159 = vector.broadcast %158 : f32 to vector<1x1xf32>
      %160 = vector.broadcast %151 : vector<1x1xf32> to vector<8x8xf32>
      %161 = arith.mulf %53, %160 : vector<8x8xf32>
      %162 = math.exp %161 : vector<8x8xf32>
      %163 = vector.shape_cast %162 : vector<8x8xf32> to vector<1x8x8xf32>
      %cst_58 = arith.constant dense<0.000000e+00> : vector<1xf32>
      %164 = vector.multi_reduction <add>, %163, %cst_58 [1, 2] : vector<1x8x8xf32> to vector<1xf32>
      %165 = vector.shape_cast %164 : vector<1xf32> to vector<1x1x1xf32>
      %166 = vector.extract %165[0, 0, 0] : f32 from vector<1x1x1xf32>
      %167 = vector.broadcast %166 : f32 to vector<1x1xf32>
      %168 = arith.addf %159, %167 : vector<1x1xf32>
      %169 = vector.broadcast %151 : vector<1x1xf32> to vector<8x8xf32>
      %170 = arith.mulf %61, %169 : vector<8x8xf32>
      %171 = math.exp %170 : vector<8x8xf32>
      %172 = vector.shape_cast %171 : vector<8x8xf32> to vector<1x8x8xf32>
      %cst_59 = arith.constant dense<0.000000e+00> : vector<1xf32>
      %173 = vector.multi_reduction <add>, %172, %cst_59 [1, 2] : vector<1x8x8xf32> to vector<1xf32>
      %174 = vector.shape_cast %173 : vector<1xf32> to vector<1x1x1xf32>
      %175 = vector.extract %174[0, 0, 0] : f32 from vector<1x1x1xf32>
      %176 = vector.broadcast %175 : f32 to vector<1x1xf32>
      %cst_60 = arith.constant 2.000000e+00 : f32
      %177 = vector.broadcast %cst_60 : f32 to vector<1x1xf32>
      %178 = arith.mulf %177, %176 : vector<1x1xf32>
      %179 = arith.subf %168, %178 : vector<1x1xf32>
      %180 = arith.addf %149, %179 : vector<1x1xf32>
      %cst_61 = arith.constant 1.250000e-01 : f32
      %181 = vector.broadcast %cst_61 : f32 to vector<1x1xf32>
      %182 = arith.mulf %86, %181 : vector<1x1xf32>
      %183 = vector.broadcast %182 : vector<1x1xf32> to vector<8x8xf32>
      %184 = arith.mulf %45, %183 : vector<8x8xf32>
      %185 = math.exp %184 : vector<8x8xf32>
      %186 = vector.shape_cast %185 : vector<8x8xf32> to vector<1x8x8xf32>
      %cst_62 = arith.constant dense<0.000000e+00> : vector<1xf32>
      %187 = vector.multi_reduction <add>, %186, %cst_62 [1, 2] : vector<1x8x8xf32> to vector<1xf32>
      %188 = vector.shape_cast %187 : vector<1xf32> to vector<1x1x1xf32>
      %189 = vector.extract %188[0, 0, 0] : f32 from vector<1x1x1xf32>
      %190 = vector.broadcast %189 : f32 to vector<1x1xf32>
      %191 = vector.broadcast %182 : vector<1x1xf32> to vector<8x8xf32>
      %192 = arith.mulf %53, %191 : vector<8x8xf32>
      %193 = math.exp %192 : vector<8x8xf32>
      %194 = vector.shape_cast %193 : vector<8x8xf32> to vector<1x8x8xf32>
      %cst_63 = arith.constant dense<0.000000e+00> : vector<1xf32>
      %195 = vector.multi_reduction <add>, %194, %cst_63 [1, 2] : vector<1x8x8xf32> to vector<1xf32>
      %196 = vector.shape_cast %195 : vector<1xf32> to vector<1x1x1xf32>
      %197 = vector.extract %196[0, 0, 0] : f32 from vector<1x1x1xf32>
      %198 = vector.broadcast %197 : f32 to vector<1x1xf32>
      %199 = arith.addf %190, %198 : vector<1x1xf32>
      %200 = vector.broadcast %182 : vector<1x1xf32> to vector<8x8xf32>
      %201 = arith.mulf %61, %200 : vector<8x8xf32>
      %202 = math.exp %201 : vector<8x8xf32>
      %203 = vector.shape_cast %202 : vector<8x8xf32> to vector<1x8x8xf32>
      %cst_64 = arith.constant dense<0.000000e+00> : vector<1xf32>
      %204 = vector.multi_reduction <add>, %203, %cst_64 [1, 2] : vector<1x8x8xf32> to vector<1xf32>
      %205 = vector.shape_cast %204 : vector<1xf32> to vector<1x1x1xf32>
      %206 = vector.extract %205[0, 0, 0] : f32 from vector<1x1x1xf32>
      %207 = vector.broadcast %206 : f32 to vector<1x1xf32>
      %cst_65 = arith.constant 2.000000e+00 : f32
      %208 = vector.broadcast %cst_65 : f32 to vector<1x1xf32>
      %209 = arith.mulf %208, %207 : vector<1x1xf32>
      %210 = arith.subf %199, %209 : vector<1x1xf32>
      %211 = arith.addf %180, %210 : vector<1x1xf32>
      %cst_66 = arith.constant 6.250000e-02 : f32
      %212 = vector.broadcast %cst_66 : f32 to vector<1x1xf32>
      %213 = arith.mulf %86, %212 : vector<1x1xf32>
      %214 = vector.broadcast %213 : vector<1x1xf32> to vector<8x8xf32>
      %215 = arith.mulf %45, %214 : vector<8x8xf32>
      %216 = math.exp %215 : vector<8x8xf32>
      %217 = vector.shape_cast %216 : vector<8x8xf32> to vector<1x8x8xf32>
      %cst_67 = arith.constant dense<0.000000e+00> : vector<1xf32>
      %218 = vector.multi_reduction <add>, %217, %cst_67 [1, 2] : vector<1x8x8xf32> to vector<1xf32>
      %219 = vector.shape_cast %218 : vector<1xf32> to vector<1x1x1xf32>
      %220 = vector.extract %219[0, 0, 0] : f32 from vector<1x1x1xf32>
      %221 = vector.broadcast %220 : f32 to vector<1x1xf32>
      %222 = vector.broadcast %213 : vector<1x1xf32> to vector<8x8xf32>
      %223 = arith.mulf %53, %222 : vector<8x8xf32>
      %224 = math.exp %223 : vector<8x8xf32>
      %225 = vector.shape_cast %224 : vector<8x8xf32> to vector<1x8x8xf32>
      %cst_68 = arith.constant dense<0.000000e+00> : vector<1xf32>
      %226 = vector.multi_reduction <add>, %225, %cst_68 [1, 2] : vector<1x8x8xf32> to vector<1xf32>
      %227 = vector.shape_cast %226 : vector<1xf32> to vector<1x1x1xf32>
      %228 = vector.extract %227[0, 0, 0] : f32 from vector<1x1x1xf32>
      %229 = vector.broadcast %228 : f32 to vector<1x1xf32>
      %230 = arith.addf %221, %229 : vector<1x1xf32>
      %231 = vector.broadcast %213 : vector<1x1xf32> to vector<8x8xf32>
      %232 = arith.mulf %61, %231 : vector<8x8xf32>
      %233 = math.exp %232 : vector<8x8xf32>
      %234 = vector.shape_cast %233 : vector<8x8xf32> to vector<1x8x8xf32>
      %cst_69 = arith.constant dense<0.000000e+00> : vector<1xf32>
      %235 = vector.multi_reduction <add>, %234, %cst_69 [1, 2] : vector<1x8x8xf32> to vector<1xf32>
      %236 = vector.shape_cast %235 : vector<1xf32> to vector<1x1x1xf32>
      %237 = vector.extract %236[0, 0, 0] : f32 from vector<1x1x1xf32>
      %238 = vector.broadcast %237 : f32 to vector<1x1xf32>
      %cst_70 = arith.constant 2.000000e+00 : f32
      %239 = vector.broadcast %cst_70 : f32 to vector<1x1xf32>
      %240 = arith.mulf %239, %238 : vector<1x1xf32>
      %241 = arith.subf %230, %240 : vector<1x1xf32>
      %242 = arith.addf %211, %241 : vector<1x1xf32>
      %cst_71 = arith.constant 6.400000e+01 : f32
      %243 = vector.broadcast %cst_71 : f32 to vector<1x1xf32>
      %244 = arith.divf %242, %243 : vector<1x1xf32>
      %c0_72 = arith.constant 0 : index
      %c0_73 = arith.constant 0 : index
      %245 = vector.load %arg3[%c0_72, %c0_73] : memref<1x1xf32, #tpu.memory_space<vmem>>, vector<1x1xf32>
      tpu.vector_store %arg3[%c0_72, %c0_73], %244 {strides = array<i32>} : memref<1x1xf32, #tpu.memory_space<vmem>>, vector<1x1xf32>,
    } else {
    }
    return
  }
  func.func @transform_0(%arg0: i32) -> (i32, i32) {
    %c0_i32 = arith.constant 0 : i32
    %c0_i32_0 = arith.constant 0 : i32
    return %c0_i32, %arg0 : i32, i32
  }
  func.func @transform_1(%arg0: i32) -> (i32, i32) {
    %c0_i32 = arith.constant 0 : i32
    %c0_i32_0 = arith.constant 0 : i32
    return %c0_i32, %arg0 : i32, i32
  }
  func.func @transform_2(%arg0: i32) -> (i32, i32) {
    %c0_i32 = arith.constant 0 : i32
    %c0_i32_0 = arith.constant 0 : i32
    %c0_i32_1 = arith.constant 0 : i32
    return %c0_i32, %c0_i32_0 : i32, i32
  }
}

</mosaic_0001>

<bundles_post_ra>
// kernel: tpu_custom_call.1
= control target key start
LH: loop header
LB: loop body
LE: loop exit
PB: predicated region body
PF: predicated region fallthrough
CT: control target
= control target key end

     0   :  { %7 = vsyncpa [#allocation6], 0  ;;  %s890_s0 = inlined_call_operand.hbm [shape: f32[8,32], index: 0, kind: input, shape index: {}]   ;;  %s891_s1 = inlined_call_operand.hbm [shape: f32[8,32], index: 1, kind: input, shape index: {}]   ;;  %s892_s2 = inlined_call_operand.hbm [shape: f32[1,1], index: 2, kind: output, shape index: {}]  }
   0x1   :  { %8 = vsyncpa [#allocation9], 0 }
   0x2   :  { %9 = vsyncpa [#allocation7], 0  ;;  %s784_s9 = smov [#allocation5]   ;;  %s785_s11 = smov [#allocation8]  }
   0x3   :  { %s16_s10 = sshll.u32 %s784_s9, 4  ;;  %s26_s12 = sshll.u32 %s785_s11, 4  ;;  %s17_s10 = int_to_ptr.vmem [resolvable:$true] %s16_s10  ;;  %s27_s12 = int_to_ptr.vmem [resolvable:$true] %s26_s12 }
   0x4   :  { %s712_s15 = scalar_lea.hbm %s890_s0, 128 }
   0x5   :  { %p713_p0 = scmp.ne.s32.totalorder %s890_s0, %s712_s15  ;;  %p716_p1 = scmp.lt.u32.totalorder %s712_s15, %s890_s0 }
   0x7   :  { %p718_p2 = pnand %p716_p1, %p713_p0 }
   0x9   :  { %721 = shalt.err (!%p718_p2)
}
   0xa   :  { %s722_s20 = scalar_lea.vmem %s17_s10, 128  ;;  %p727_p4 = scmp.lt.s32.totalorder %s17_s10, %s17_s10 }
   0xb   :  { %p723_p3 = scmp.ne.s32.totalorder %s17_s10, %s722_s20  ;;  %p728_p5 = scmp.lt.s32.totalorder %s722_s20, %s722_s20 }
   0xd   :  { %p729_p6 = por %p728_p5, %p727_p4 }
   0xf   :  { %p730_p7 = pnand %p729_p6, %p723_p3 }
  0x11   :  { %733 = shalt.err (!%p730_p7)
}
  0x12   :  { %19 = dma.hbm_to_vmem [thread:$0]  %s890_s0, 128, %s17_s10, [#allocation6]  }
  0x13   :  { %s734_s25 = scalar_lea.hbm %s891_s1, 128 }
  0x14   :  { %p735_p8 = scmp.ne.s32.totalorder %s891_s1, %s734_s25  ;;  %p738_p9 = scmp.lt.u32.totalorder %s734_s25, %s891_s1 }
  0x16   :  { %p740_p10 = pnand %p738_p9, %p735_p8 }
  0x18   :  { %743 = shalt.err (!%p740_p10)
}
  0x19   :  { %s744_s30 = scalar_lea.vmem %s27_s12, 128  ;;  %p749_p12 = scmp.lt.s32.totalorder %s27_s12, %s27_s12 }
  0x1a   :  { %p745_p11 = scmp.ne.s32.totalorder %s27_s12, %s744_s30  ;;  %p750_p13 = scmp.lt.s32.totalorder %s744_s30, %s744_s30 }
  0x1c   :  { %p751_p0 = por %p750_p13, %p749_p12 }
  0x1e   :  { %p752_p1 = pnand %p751_p0, %p745_p11 }
  0x20   :  { %755 = shalt.err (!%p752_p1)
}
  0x21   :  { %29 = dma.hbm_to_vmem [thread:$0]  %s891_s1, 128, %s27_s12, [#allocation9]  }
  0x22   :  { %778 = dma.done.wait [#allocation6], 128  }
  0x23   :  { %779 = vsyncadd [#allocation6], 4294967168 }
  0x24   :  { %780 = dma.done.wait [#allocation9], 128  }
  0x25   :  { %781 = vsyncadd [#allocation9], 4294967168  ;;  %vm40_vm0 = vcmask 64512   ;;  %v786_v0 = vmov 0.0   ;;  %vm787_vm1 = vmmov 0   ;;  %vm47_vm2 = vcmask 261120  }
  0x26   :  { %624 = vmatprep.subr.mxu0 %v786_v0  ;;  %629 = vmatprep.subr.mxu1 %v786_v0  ;;  %41 = vst.msk [vmem:[#allocation2] sm:$0xff] %vm40_vm0, %v786_v0  ;;  %42 = vst.msk [vmem:[#allocation3] sm:$0xff] %vm40_vm0, %v786_v0  ;;  %v44_v1 = vld [vmem:[#allocation5] sm:$0xff]  ;;  %v45_v2 = vld [vmem:[#allocation8] sm:$0xff]  ;;  %v279_v7 = vlaneseq  ;;  %s788_s21 = smov [#allocation10]   ;;  %vm594_vm4 = vcmask 0  }
  0x27   :  { %43 = vst.msk [vmem:[#allocation4] sm:$0xff] %vm40_vm0, %v786_v0  ;;  %626 = vmatprep.mubr.msk.f32.mxu0 %vm787_vm1, %v786_v0  ;;  %631 = vmatprep.mubr.msk.f32.mxu1 %vm787_vm1, %v786_v0  ;;  %s602_s22 = sshll.u32 %s788_s21, 4  ;;  %s603_s22 = int_to_ptr.vmem [resolvable:$true] %s602_s22 }
  0x28   :  { %625 = vmatpush3.xpose.msk.msra.mxu0 %vm47_vm2, %v44_v1  ;;  %630 = vmatpush3.xpose.msk.msra.mxu1 %vm47_vm2, %v45_v2  ;;  %v280_v13 = vshrl.u32 %v279_v7, 7  ;;  %v282_v14 = vand.u32 127, %v279_v7  ;;  %s756_s23 = scalar_lea.vmem %s603_s22, 16  ;;  %s760_s24 = scalar_lea.vmem %s603_s22, 32 }
  0x29   :  { %634 = vmatprep.subr.mxu0 %v786_v0  ;;  %p757_p2 = scmp.ne.s32.totalorder %s603_s22, %s756_s23  ;;  %p761_p3 = scmp.lt.s32.totalorder %s603_s22, %s603_s22 }
  0x2a   :  { %vm283_vm3 = vcmp.eq.s32.totalorder %v280_v13, %v282_v14  ;;  %p762_p4 = scmp.lt.s32.totalorder %s760_s24, %s756_s23 }
  0x2b   :  { %627 = vmatmul.mubr.msk.f32.vlgmr.msra.gmra.mrb[0].mxu0 %vm47_vm2, %v44_v1  ;;  %632 = vmatmul.mubr.msk.f32.vlgmr.msra.gmra.mrb[0].mxu1 %vm47_vm2, %v45_v2 }
  0x2c   :  { %635 = vmatpush3.xpose.msk.msra.mxu0 %vm47_vm2, %v45_v2  ;;  %636 = vmatprep.mubr.msk.f32.mxu0 %vm787_vm1, %v786_v0  ;;  %p763_p5 = por %p762_p4, %p761_p3 }
  0x2d   :  { %v46_v3 = vld [vmem:[#allocation2] sm:$0xff]  ;;  %v124_v4 = vld [vmem:[#allocation3] sm:$0xff] }
  0x2e   :  { %v200_v12 = vld [vmem:[#allocation4] sm:$0xff]  ;;  %p764_p6 = pnand %p763_p5, %p757_p2 }
  0x2f   :  { %637 = vmatmul.mubr.msk.f32.vlgmr.msra.gmra.mrb[2].mxu0 %vm47_vm2, %v44_v1 }
  0xfe   :  { %v117_v5 = vpop.f32.mrb[0].mxu0  ;;  %v194_v6 = vpop.f32.mrb[0].mxu1 }
  0xff   :  { %v121_v8 = vadd.f32 %v117_v5, %v46_v3  ;;  %v198_v9 = vadd.f32 %v194_v6, %v124_v4  ;;  %v628_v10 = vpop.f32.mrb[1].mxu0  ;;  %v633_v11 = vpop.f32.mrb[1].mxu1 }
 0x101   :  { %123 = vst.msk [vmem:[#allocation2] sm:$0xff] %vm40_vm0, %v121_v8  ;;  %199 = vst.msk [vmem:[#allocation3] sm:$0xff] %vm40_vm0, %v198_v9 }
 0x102   :  { %v267_v15 = vpop.f32.mrb[2].mxu0 }
 0x103   :  { %v271_v16 = vadd.f32 %v267_v15, %v200_v12  ;;  %v638_v17 = vpop.f32.mrb[3].mxu0 }
 0x105   :  { %272 = vst.msk [vmem:[#allocation4] sm:$0xff] %vm40_vm0, %v271_v16 }
 0x108   :  { %v276_v18 = vld [vmem:[#allocation2] sm:$0xff]  ;;  %v277_v19 = vld [vmem:[#allocation3] sm:$0xff] }
 0x109   :  { %v284_v20 = vsel %vm283_vm3, %v276_v18, 0.0  ;;  %v285_v22 = vsel %vm283_vm3, %v277_v19, 0.0  ;;  %v305_v39 = vmul.f32 2.0, %v276_v18  ;;  %v309_v47 = vmul.f32 2.0, %v277_v19 }
 0x10a   :  { %v286_v21 = vsel %vm40_vm0, %v284_v20, 0.0  ;;  %v295_v23 = vsel %vm40_vm0, %v285_v22, 0.0 }
 0x10b   :  { %287 = vadd.xlane.f32.xlu0 %v286_v21  ;;  %v289_v24 = vrot.slane %v286_v21, 4  ;;  %v298_v25 = vrot.slane %v295_v23, 4 }
 0x10c   :  { %v278_v34 = vld [vmem:[#allocation4] sm:$0xff] }
 0x10d   :  { %v290_v26 = vadd.f32 %v289_v24, %v286_v21  ;;  %v299_v27 = vadd.f32 %v298_v25, %v295_v23  ;;  %v313_v36 = vmul.f32 2.0, %v278_v34 }
 0x10f   :  { %296 = vadd.xlane.f32.xlu0 %v295_v23  ;;  %v291_v28 = vrot.slane %v290_v26, 2  ;;  %v300_v29 = vrot.slane %v299_v27, 2 }
 0x111   :  { %v301_v30 = vadd.f32 %v300_v29, %v299_v27  ;;  %v292_v31 = vadd.f32 %v291_v28, %v290_v26 }
 0x113   :  { %v302_v32 = vrot.slane %v301_v30, 1  ;;  %v293_v33 = vrot.slane %v292_v31, 1 }
 0x115   :  { %v303_v35 = vadd.f32 %v302_v32, %v301_v30  ;;  %v294_v37 = vadd.f32 %v293_v33, %v292_v31 }
 0x198   :  { %v288_v38 = vpop.xlane.xlu0 %287 }
 0x199   :  { %v304_v40 = vadd.f32 %v294_v37, %v288_v38  ;;  %v312_v41 = vadd.f32 %v303_v35, %v288_v38 }
 0x19b   :  { %v306_v42 = vsub.f32 %v304_v40, %v305_v39  ;;  %v314_v43 = vsub.f32 %v312_v41, %v313_v36 }
 0x19c   :  { %v297_v44 = vpop.xlane.xlu0 %296 }
 0x19d   :  { %v836_v45 = vmax.f32 %v306_v42, 0.0  ;;  %v838_v46 = vmax.f32 %v314_v43, 0.0  ;;  %v308_v48 = vadd.f32 %v303_v35, %v297_v44 }
 0x19f   :  { %v310_v49 = vsub.f32 %v308_v48, %v309_v47  ;;  %v339_v50 = vsel %vm40_vm0, %v838_v46, 0.0  ;;  %v316_v51 = vsel %vm40_vm0, %v836_v45, 0.0 }
 0x1a0   :  { %340 = vadd.xlane.f32.xlu0 %v339_v50  ;;  %317 = vadd.xlane.f32.xlu1 %v316_v51 }
 0x1a1   :  { %v844_v52 = vmax.f32 %v310_v49, 0.0 }
 0x1a3   :  { %v327_v53 = vsel %vm40_vm0, %v844_v52, 0.0 }
 0x1a4   :  { %328 = vadd.xlane.f32.xlu1 %v327_v53 }
 0x22d   :  { %v341_v54 = vpop.xlane.xlu0 %340  ;;  %v318_v55 = vpop.xlane.xlu1 %317 }
 0x22e   :  { %v342_v56 = vrot.slane %v341_v54, 4  ;;  %v319_v57 = vrot.slane %v318_v55, 4 }
 0x230   :  { %v343_v58 = vadd.f32 %v342_v56, %v341_v54  ;;  %v320_v59 = vadd.f32 %v319_v57, %v318_v55 }
 0x231   :  { %v329_v60 = vpop.xlane.xlu1 %328 }
 0x232   :  { %v344_v61 = vrot.slane %v343_v58, 2  ;;  %v321_v62 = vrot.slane %v320_v59, 2  ;;  %v330_v63 = vrot.slane %v329_v60, 4 }
 0x234   :  { %v331_v0 = vadd.f32 %v330_v63, %v329_v60  ;;  %v322_v1 = vadd.f32 %v321_v62, %v320_v59  ;;  %v345_v2 = vadd.f32 %v344_v61, %v343_v58 }
 0x236   :  { %v332_v3 = vrot.slane %v331_v0, 2  ;;  %v323_v4 = vrot.slane %v322_v1, 1  ;;  %v346_v7 = vrot.slane %v345_v2, 1 }
 0x238   :  { %v324_v5 = vadd.f32 %v323_v4, %v322_v1  ;;  %v333_v6 = vadd.f32 %v332_v3, %v331_v0  ;;  %v347_v10 = vadd.f32 %v346_v7, %v345_v2 }
 0x23a   :  { %639 = vpush %v324_v5  ;;  %v334_v8 = vrot.slane %v333_v6, 1 }
 0x23c   :  { %v335_v9 = vadd.f32 %v334_v8, %v333_v6 }
 0x23e   :  { %641 = vpush %v335_v9 }
 0x23f   :  { %643 = vpush %v347_v10 }
 0x26b   :  { %s640_s1 = spop %639 }
 0x26c   :  { %v326_v11 = vstv %s640_s1 }
 0x26f   :  { %s642_s4 = spop %641 }
 0x270   :  { %v337_v12 = vstv %s642_s4  ;;  %s644_s5 = spop %643 }
 0x271   :  { %v338_v13 = vadd.f32 %v337_v12, %v326_v11  ;;  %v349_v14 = vstv %s644_s5 }
 0x272   :  { %v350_v15 = vmul.f32 2.0, %v349_v14 }
 0x274   :  { %v351_v16 = vadd.f32 %v350_v15, %v338_v13 }
 0x276   :  { %v353_v17 = vmul.f32 0.004166667, %v351_v16 }
 0x278   :  { %v355_v18 = vmul.f32 0.25, %v353_v17 }
 0x27a   :  { %680 = vrcp.f32 %v355_v18 }
 0x284   :  { %v681_v19 = vpop.eup %680 }
 0x285   :  { %v357_v20 = vmul.f32 -1.0, %v681_v19 }
 0x287   :  { %v372_v21 = vmul.f32 %v357_v20, %v844_v52  ;;  %v358_v22 = vmul.f32 %v357_v20, %v836_v45  ;;  %v404_v23 = vmul.f32 0.5, %v357_v20  ;;  %v387_v24 = vmul.f32 %v357_v20, %v838_v46 }
 0x288   :  { %v451_v28 = vmul.f32 0.25, %v357_v20  ;;  %v498_v35 = vmul.f32 0.125, %v357_v20  ;;  %v545_v47 = vmul.f32 0.0625, %v357_v20 }
 0x289   :  { %v373_v25 = vmul.f32 1.442695, %v372_v21  ;;  %v359_v26 = vmul.f32 1.442695, %v358_v22  ;;  %v405_v27 = vmul.f32 %v404_v23, %v836_v45  ;;  %v388_v29 = vmul.f32 1.442695, %v387_v24 }
 0x28a   :  { %v434_v30 = vmul.f32 %v404_v23, %v838_v46  ;;  %v419_v31 = vmul.f32 %v404_v23, %v844_v52  ;;  %v466_v34 = vmul.f32 %v451_v28, %v844_v52  ;;  %v452_v37 = vmul.f32 %v451_v28, %v836_v45 }
 0x28b   :  { %682 = vpow2.f32 %v373_v25  ;;  %v406_v32 = vmul.f32 1.442695, %v405_v27  ;;  %v499_v39 = vmul.f32 %v498_v35, %v836_v45  ;;  %v481_v41 = vmul.f32 %v451_v28, %v838_v46 }
 0x28c   :  { %684 = vpow2.f32 %v359_v26  ;;  %v435_v33 = vmul.f32 1.442695, %v434_v30  ;;  %v420_v36 = vmul.f32 1.442695, %v419_v31  ;;  %v467_v38 = vmul.f32 1.442695, %v466_v34 }
 0x28d   :  { %686 = vpow2.f32 %v406_v32  ;;  %v453_v40 = vmul.f32 1.442695, %v452_v37  ;;  %v500_v43 = vmul.f32 1.442695, %v499_v39  ;;  %v528_v44 = vmul.f32 %v498_v35, %v838_v46 }
 0x28e   :  { %688 = vpow2.f32 %v388_v29  ;;  %v482_v50 = vmul.f32 1.442695, %v481_v41  ;;  %v513_v51 = vmul.f32 %v498_v35, %v844_v52  ;;  %v560_v57 = vmul.f32 %v545_v47, %v844_v52 }
 0x28f   :  { %690 = vpow2.f32 %v435_v33  ;;  %v529_v56 = vmul.f32 1.442695, %v528_v44  ;;  %v546_v60 = vmul.f32 %v545_v47, %v836_v45  ;;  %v575_v52 = vmul.f32 %v545_v47, %v838_v46 }
 0x290   :  { %692 = vpow2.f32 %v420_v36  ;;  %v514_v59 = vmul.f32 1.442695, %v513_v51  ;;  %v561_v0 = vmul.f32 1.442695, %v560_v57 }
 0x291   :  { %694 = vpow2.f32 %v467_v38  ;;  %v547_v2 = vmul.f32 1.442695, %v546_v60  ;;  %v576_v6 = vmul.f32 1.442695, %v575_v52 }
 0x292   :  { %696 = vpow2.f32 %v453_v40 }
 0x293   :  { %698 = vpow2.f32 %v500_v43 }
 0x294   :  { %700 = vpow2.f32 %v482_v50 }
 0x295   :  { %v683_v42 = vpop.eup %682  ;;  %702 = vpow2.f32 %v529_v56 }
 0x296   :  { %v685_v48 = vpop.eup %684  ;;  %v375_v49 = vsel %vm40_vm0, %v683_v42, 0.0  ;;  %704 = vpow2.f32 %v514_v59 }
 0x297   :  { %v687_v53 = vpop.eup %686  ;;  %376 = vadd.xlane.f32.xlu0 %v375_v49  ;;  %v361_v54 = vsel %vm40_vm0, %v685_v48, 0.0  ;;  %706 = vpow2.f32 %v561_v0 }
 0x298   :  { %v689_v55 = vpop.eup %688  ;;  %362 = vadd.xlane.f32.xlu1 %v361_v54  ;;  %v408_v58 = vsel %vm40_vm0, %v687_v53, 0.0  ;;  %708 = vpow2.f32 %v547_v2 }
 0x299   :  { %v691_v61 = vpop.eup %690  ;;  %v390_v62 = vsel %vm40_vm0, %v689_v55, 0.0  ;;  %710 = vpow2.f32 %v576_v6 }
 0x29a   :  { %v693_v63 = vpop.eup %692  ;;  %v437_v1 = vsel %vm40_vm0, %v691_v61, 0.0 }
 0x29b   :  { %409 = vadd.xlane.f32.xlu0 %v408_v58  ;;  %v695_v3 = vpop.eup %694  ;;  %v422_v4 = vsel %vm40_vm0, %v693_v63, 0.0 }
 0x29c   :  { %391 = vadd.xlane.f32.xlu1 %v390_v62  ;;  %v697_v5 = vpop.eup %696  ;;  %v469_v45 = vsel %vm40_vm0, %v695_v3, 0.0 }
 0x29d   :  { %v699_v7 = vpop.eup %698  ;;  %v455_v8 = vsel %vm40_vm0, %v697_v5, 0.0 }
 0x29e   :  { %v701_v9 = vpop.eup %700  ;;  %v502_v10 = vsel %vm40_vm0, %v699_v7, 0.0 }
 0x29f   :  { %438 = vadd.xlane.f32.xlu0 %v437_v1  ;;  %v703_v46 = vpop.eup %702  ;;  %v484_v11 = vsel %vm40_vm0, %v701_v9, 0.0 }
 0x2a0   :  { %423 = vadd.xlane.f32.xlu1 %v422_v4  ;;  %v705_v12 = vpop.eup %704  ;;  %v531_v13 = vsel %vm40_vm0, %v703_v46, 0.0 }
 0x2a1   :  { %v707_v14 = vpop.eup %706  ;;  %v516_v15 = vsel %vm40_vm0, %v705_v12, 0.0 }
 0x2a2   :  { %v709_v16 = vpop.eup %708  ;;  %v563_v17 = vsel %vm40_vm0, %v707_v14, 0.0 }
 0x2a3   :  { %470 = vadd.xlane.f32.xlu0 %v469_v45  ;;  %v549_v18 = vsel %vm40_vm0, %v709_v16, 0.0  ;;  %v711_v19 = vpop.eup %710 }
 0x2a4   :  { %456 = vadd.xlane.f32.xlu1 %v455_v8  ;;  %v578_v20 = vsel %vm40_vm0, %v711_v19, 0.0 }
 0x2a7   :  { %503 = vadd.xlane.f32.xlu0 %v502_v10 }
 0x2a8   :  { %485 = vadd.xlane.f32.xlu1 %v484_v11 }
 0x2ab   :  { %532 = vadd.xlane.f32.xlu0 %v531_v13 }
 0x2ac   :  { %517 = vadd.xlane.f32.xlu1 %v516_v15 }
 0x2af   :  { %564 = vadd.xlane.f32.xlu0 %v563_v17 }
 0x2b0   :  { %550 = vadd.xlane.f32.xlu1 %v549_v18 }
 0x2b4   :  { %579 = vadd.xlane.f32.xlu1 %v578_v20 }
 0x324   :  { %v377_v21 = vpop.xlane.xlu0 %376 }
 0x325   :  { %v378_v22 = vrot.slane %v377_v21, 4  ;;  %v363_v23 = vpop.xlane.xlu1 %362 }
 0x326   :  { %v364_v24 = vrot.slane %v363_v23, 4 }
 0x327   :  { %v379_v25 = vadd.f32 %v378_v22, %v377_v21 }
 0x328   :  { %v365_v26 = vadd.f32 %v364_v24, %v363_v23  ;;  %v410_v27 = vpop.xlane.xlu0 %409 }
 0x329   :  { %v380_v28 = vrot.slane %v379_v25, 2  ;;  %v411_v29 = vrot.slane %v410_v27, 4  ;;  %v392_v30 = vpop.xlane.xlu1 %391 }
 0x32a   :  { %v366_v31 = vrot.slane %v365_v26, 2  ;;  %v393_v32 = vrot.slane %v392_v30, 4 }
 0x32b   :  { %v412_v33 = vadd.f32 %v411_v29, %v410_v27  ;;  %v381_v34 = vadd.f32 %v380_v28, %v379_v25 }
 0x32c   :  { %v394_v35 = vadd.f32 %v393_v32, %v392_v30  ;;  %v439_v36 = vpop.xlane.xlu0 %438  ;;  %v367_v37 = vadd.f32 %v366_v31, %v365_v26 }
 0x32d   :  { %v413_v38 = vrot.slane %v412_v33, 2  ;;  %v440_v39 = vrot.slane %v439_v36, 4  ;;  %v424_v40 = vpop.xlane.xlu1 %423  ;;  %v382_v41 = vrot.slane %v381_v34, 1 }
 0x32e   :  { %v395_v42 = vrot.slane %v394_v35, 2  ;;  %v425_v43 = vrot.slane %v424_v40, 4  ;;  %v368_v44 = vrot.slane %v367_v37, 1 }
 0x32f   :  { %v441_v47 = vadd.f32 %v440_v39, %v439_v36  ;;  %v383_v48 = vadd.f32 %v382_v41, %v381_v34  ;;  %v414_v49 = vadd.f32 %v413_v38, %v412_v33 }
 0x330   :  { %v426_v50 = vadd.f32 %v425_v43, %v424_v40  ;;  %v471_v51 = vpop.xlane.xlu0 %470  ;;  %v369_v53 = vadd.f32 %v368_v44, %v367_v37  ;;  %v396_v54 = vadd.f32 %v395_v42, %v394_v35 }
 0x331   :  { %v442_v55 = vrot.slane %v441_v47, 2  ;;  %v472_v56 = vrot.slane %v471_v51, 4  ;;  %v457_v57 = vpop.xlane.xlu1 %456  ;;  %v415_v58 = vrot.slane %v414_v49, 1 }
 0x332   :  { %v427_v59 = vrot.slane %v426_v50, 2  ;;  %v458_v60 = vrot.slane %v457_v57, 4  ;;  %645 = vpush %v369_v53  ;;  %v397_v61 = vrot.slane %v396_v54, 1 }
 0x333   :  { %v473_v62 = vadd.f32 %v472_v56, %v471_v51  ;;  %647 = vpush %v383_v48  ;;  %v416_v63 = vadd.f32 %v415_v58, %v414_v49  ;;  %v443_v0 = vadd.f32 %v442_v55, %v441_v47 }
 0x334   :  { %v459_v1 = vadd.f32 %v458_v60, %v457_v57  ;;  %v504_v2 = vpop.xlane.xlu0 %503  ;;  %v398_v52 = vadd.f32 %v397_v61, %v396_v54  ;;  %v428_v3 = vadd.f32 %v427_v59, %v426_v50 }
 0x335   :  { %v474_v4 = vrot.slane %v473_v62, 2  ;;  %v505_v5 = vrot.slane %v504_v2, 4  ;;  %v486_v45 = vpop.xlane.xlu1 %485  ;;  %v444_v6 = vrot.slane %v443_v0, 1 }
 0x336   :  { %v460_v7 = vrot.slane %v459_v1, 2  ;;  %v487_v8 = vrot.slane %v486_v45, 4  ;;  %649 = vpush %v398_v52  ;;  %v429_v9 = vrot.slane %v428_v3, 1 }
 0x337   :  { %v506_v10 = vadd.f32 %v505_v5, %v504_v2  ;;  %651 = vpush %v416_v63  ;;  %v445_v46 = vadd.f32 %v444_v6, %v443_v0  ;;  %v475_v11 = vadd.f32 %v474_v4, %v473_v62 }
 0x338   :  { %v488_v12 = vadd.f32 %v487_v8, %v486_v45  ;;  %v533_v13 = vpop.xlane.xlu0 %532  ;;  %v430_v14 = vadd.f32 %v429_v9, %v428_v3  ;;  %v461_v15 = vadd.f32 %v460_v7, %v459_v1 }
 0x339   :  { %v507_v16 = vrot.slane %v506_v10, 2  ;;  %v534_v17 = vrot.slane %v533_v13, 4  ;;  %v518_v18 = vpop.xlane.xlu1 %517  ;;  %v476_v19 = vrot.slane %v475_v11, 1 }
 0x33a   :  { %v489_v20 = vrot.slane %v488_v12, 2  ;;  %v519_v21 = vrot.slane %v518_v18, 4  ;;  %653 = vpush %v430_v14  ;;  %v462_v22 = vrot.slane %v461_v15, 1 }
 0x33b   :  { %v535_v23 = vadd.f32 %v534_v17, %v533_v13  ;;  %655 = vpush %v445_v46  ;;  %v477_v24 = vadd.f32 %v476_v19, %v475_v11  ;;  %v508_v25 = vadd.f32 %v507_v16, %v506_v10 }
 0x33c   :  { %v520_v26 = vadd.f32 %v519_v21, %v518_v18  ;;  %v565_v27 = vpop.xlane.xlu0 %564  ;;  %v463_v28 = vadd.f32 %v462_v22, %v461_v15  ;;  %v490_v29 = vadd.f32 %v489_v20, %v488_v12 }
 0x33d   :  { %v536_v30 = vrot.slane %v535_v23, 2  ;;  %v566_v31 = vrot.slane %v565_v27, 4  ;;  %v551_v32 = vpop.xlane.xlu1 %550  ;;  %v509_v33 = vrot.slane %v508_v25, 1 }
 0x33e   :  { %v521_v34 = vrot.slane %v520_v26, 2  ;;  %v552_v35 = vrot.slane %v551_v32, 4  ;;  %657 = vpush %v463_v28  ;;  %v491_v36 = vrot.slane %v490_v29, 1 }
 0x33f   :  { %v567_v37 = vadd.f32 %v566_v31, %v565_v27  ;;  %659 = vpush %v477_v24  ;;  %v510_v38 = vadd.f32 %v509_v33, %v508_v25  ;;  %v537_v39 = vadd.f32 %v536_v30, %v535_v23 }
 0x340   :  { %v553_v40 = vadd.f32 %v552_v35, %v551_v32  ;;  %v492_v41 = vadd.f32 %v491_v36, %v490_v29  ;;  %v522_v42 = vadd.f32 %v521_v34, %v520_v26 }
 0x341   :  { %v568_v43 = vrot.slane %v567_v37, 2  ;;  %v580_v44 = vpop.xlane.xlu1 %579  ;;  %v538_v47 = vrot.slane %v537_v39, 1 }
 0x342   :  { %v554_v48 = vrot.slane %v553_v40, 2  ;;  %v581_v49 = vrot.slane %v580_v44, 4  ;;  %661 = vpush %v492_v41  ;;  %v523_v50 = vrot.slane %v522_v42, 1 }
 0x343   :  { %v569_v51 = vadd.f32 %v568_v43, %v567_v37  ;;  %663 = vpush %v510_v38  ;;  %v539_v53 = vadd.f32 %v538_v47, %v537_v39 }
 0x344   :  { %v582_v54 = vadd.f32 %v581_v49, %v580_v44  ;;  %v524_v55 = vadd.f32 %v523_v50, %v522_v42  ;;  %v555_v56 = vadd.f32 %v554_v48, %v553_v40 }
 0x345   :  { %v570_v57 = vrot.slane %v569_v51, 1 }
 0x346   :  { %v583_v58 = vrot.slane %v582_v54, 2  ;;  %665 = vpush %v524_v55  ;;  %v556_v59 = vrot.slane %v555_v56, 1 }
 0x347   :  { %667 = vpush %v539_v53  ;;  %v571_v60 = vadd.f32 %v570_v57, %v569_v51 }
 0x348   :  { %v584_v61 = vadd.f32 %v583_v58, %v582_v54  ;;  %v557_v62 = vadd.f32 %v556_v59, %v555_v56 }
 0x34a   :  { %669 = vpush %v557_v62  ;;  %v585_v63 = vrot.slane %v584_v61, 1 }
 0x34b   :  { %671 = vpush %v571_v60 }
 0x34c   :  { %v586_v0 = vadd.f32 %v585_v63, %v584_v61 }
 0x34e   :  { %673 = vpush %v586_v0 }
 0x363   :  { %s646_s6 = spop %645 }
 0x364   :  { %s648_s7 = spop %647  ;;  %v371_v5 = vstv %s646_s6 }
 0x365   :  { %v385_v45 = vstv %s648_s7 }
 0x366   :  { %v386_v13 = vadd.f32 %v385_v45, %v371_v5 }
 0x367   :  { %s650_s8 = spop %649 }
 0x368   :  { %s652_s9 = spop %651  ;;  %v400_v52 = vstv %s650_s8 }
 0x369   :  { %v418_v3 = vstv %s652_s9  ;;  %v401_v46 = vmul.f32 2.0, %v400_v52 }
 0x36b   :  { %s654_s10 = spop %653  ;;  %v402_v19 = vsub.f32 %v386_v13, %v401_v46 }
 0x36c   :  { %s656_s11 = spop %655  ;;  %v432_v1 = vstv %s654_s10 }
 0x36d   :  { %v447_v2 = vstv %s656_s11  ;;  %v433_v6 = vadd.f32 %v432_v1, %v418_v3 }
 0x36e   :  { %v448_v7 = vmul.f32 2.0, %v447_v2 }
 0x36f   :  { %s658_s12 = spop %657 }
 0x370   :  { %s660_s13 = spop %659  ;;  %v465_v8 = vstv %s658_s12  ;;  %v449_v15 = vsub.f32 %v433_v6, %v448_v7 }
 0x371   :  { %v479_v9 = vstv %s660_s13 }
 0x372   :  { %v480_v16 = vadd.f32 %v479_v9, %v465_v8  ;;  %v450_v23 = vadd.f32 %v449_v15, %v402_v19 }
 0x373   :  { %s662_s14 = spop %661 }
 0x374   :  { %v494_v4 = vstv %s662_s14  ;;  %s664_s15 = spop %663 }
 0x375   :  { %v495_v11 = vmul.f32 2.0, %v494_v4  ;;  %v512_v14 = vstv %s664_s15 }
 0x377   :  { %s666_s16 = spop %665  ;;  %v496_v20 = vsub.f32 %v480_v16, %v495_v11 }
 0x378   :  { %v526_v10 = vstv %s666_s16  ;;  %s668_s17 = spop %667 }
 0x379   :  { %v541_v12 = vstv %s668_s17  ;;  %v527_v17 = vadd.f32 %v526_v10, %v512_v14  ;;  %v497_v26 = vadd.f32 %v496_v20, %v450_v23 }
 0x37a   :  { %v542_v18 = vmul.f32 2.0, %v541_v12 }
 0x37b   :  { %s670_s18 = spop %669 }
 0x37c   :  { %s672_s19 = spop %671  ;;  %v559_v21 = vstv %s670_s18  ;;  %v543_v24 = vsub.f32 %v527_v17, %v542_v18 }
 0x37d   :  { %v573_v22 = vstv %s672_s19 }
 0x37e   :  { %v574_v27 = vadd.f32 %v573_v22, %v559_v21  ;;  %v544_v29 = vadd.f32 %v543_v24, %v497_v26 }
 0x37f   :  { %s674_s20 = spop %673 }
 0x380   :  { %v588_v25 = vstv %s674_s20 }
 0x381   :  { %v589_v28 = vmul.f32 2.0, %v588_v25 }
 0x383   :  { %v590_v30 = vsub.f32 %v574_v27, %v589_v28 }
 0x385   :  { %v591_v31 = vadd.f32 %v590_v30, %v544_v29 }
 0x387   :  { %v593_v32 = vmul.f32 0.015625, %v591_v31 }
 0x389   :  { %595 = vst.msk [vmem:[#allocation10] sm:$0x1] %vm594_vm4, %v593_v32 }
 0x38a   :  { %767 = shalt.err (!%p764_p6)
}
 0x38b   :  { %s768_s27 = scalar_lea.hbm %s892_s2, 16 }
 0x38c   :  { %p769_p7 = scmp.ne.s32.totalorder %s892_s2, %s768_s27  ;;  %p772_p8 = scmp.lt.u32.totalorder %s768_s27, %s892_s2 }
 0x38e   :  { %p774_p9 = pnand %p772_p8, %p769_p7 }
 0x390   :  { %777 = shalt.err (!%p774_p9)
}
 0x391   :  { %605 = dma.vmem_to_hbm [thread:$0]  %s603_s22, 16, %s892_s2, [#allocation7]  }
 0x392   :  { %782 = dma.done.wait [#allocation7], 16  }
 0x393   :  { %783 = vsyncadd [#allocation7], 4294967280 }
 0x394   :  { %609 = vsyncpa [#allocation6], 1 }
 0x395   :  { %610 = vsyncpa [#allocation9], 1 }
 0x396   :  { %611 = vsyncpa [#allocation7], 1 }

</bundles_post_ra>
